<compile_context>
chip_gen: v7x
topology: tpu7x:2x2x1
jax: 0.10.0
libtpu: 0.0.40
codegen_flags: <defaults>
</compile_context>

<pallas_src>
import functools

import jax
import jax.numpy as jnp
from jax import lax
from jax.experimental import pallas as pl
from jax.experimental.pallas import tpu as pltpu

_LANE = 128
_SUBLANE = 8
_V_CHUNK = 1024                       # max one-hot width held live (multiple of 256)
_VMEM_BUDGET = 28 * 1024 * 1024       # ~70% of a conservative 40 MiB/TC working-set cap
_MAX_TILE = 4096                      # past ~2 MiB/step output there is no step-cost win


def _round_up(x, m):
    return (x + m - 1) // m * m


def _divisors_desc(n):
    divs = set()
    i = 1
    while i * i <= n:
        if n % i == 0:
            divs.add(i)
            divs.add(n // i)
        i += 1
    return sorted(divs, reverse=True)


def _working_set_bytes(T, S, Vp, Dp, tok_bytes, pe_bytes, out_bytes, sel_bytes):
    """Estimated VMEM working set for a token tile of T rows."""
    tok = Vp * Dp * tok_bytes                               # resident table (1 buffer)
    if T % S == 0:
        pe = T * Dp * pe_bytes                              # resident pre-tiled PE
    else:
        pe = 2 * T * Dp * pe_bytes                          # blocked PE, double-buffered
    ids = 2 * T * 4                                         # double-buffered ids
    out = 2 * T * Dp * out_bytes                            # double-buffered output
    tmp = T * min(Vp, _V_CHUNK) * sel_bytes + 2 * T * Dp * 4  # one-hot + f32 temps
    return tok + pe + ids + out + tmp


def _pick_token_tile(N, S, Vp, Dp, tok_bytes, pe_bytes, out_bytes, sel_bytes):
    """Largest tile T (divisor of N, PE-alignable, sublane-friendly) within budget."""
    fallback = None
    for t in _divisors_desc(N):
        if t > _MAX_TILE:
            continue
        if not (t % S == 0 or S % t == 0):     # PE rows recoverable per tile
            continue
        if not (t % _SUBLANE == 0 or t == N):  # (8, 128) block-shape constraint
            continue
        if _working_set_bytes(t, S, Vp, Dp, tok_bytes, pe_bytes, out_bytes,
                              sel_bytes) <= _VMEM_BUDGET:
            return t
        fallback = t                           # smallest legal tile seen so far
    # Nothing fit the budget: take the smallest legal tile (vmem_limit stretches),
    # or the whole axis for pathological N with no legal divisor.
    return fallback if fallback is not None else N


def _text_embedding_kernel(ids_ref, tok_ref, pe_ref, o_ref, *, scale, sel_dtype,
                           precision, v_chunk):
    # ids_ref: (T, 1) int32   token ids for this tile
    # tok_ref: (Vp, Dp)       full (padded) token-embedding table, VMEM resident
    # pe_ref : (T, Dp)        positional-encoding rows for this tile
    # o_ref  : (T, Dp)        output tile
    T, Dp = o_ref.shape
    Vp = tok_ref.shape[0]
    ids = ids_ref[...]                                              # (T, 1)

    def gather(start, width):
        # One-hot row-select on the MXU: rows of one_hot pick rows of the table.
        iota = lax.broadcasted_iota(jnp.int32, (T, width), 1) + start
        one_hot = (ids == iota).astype(sel_dtype)                   # (T, width)
        return jnp.dot(one_hot, tok_ref[pl.ds(start, width), :],
                       preferred_element_type=jnp.float32,
                       precision=precision)                         # (T, Dp) f32

    if Vp <= v_chunk:
        gathered = gather(0, Vp)
    else:
        # Chunk the contraction over V so the live one-hot stays (T, v_chunk).
        def body(c, acc):
            return acc + gather(pl.multiple_of(c * v_chunk, v_chunk), v_chunk)

        gathered = lax.fori_loop(0, Vp // v_chunk, body,
                                 jnp.zeros((T, Dp), jnp.float32), unroll=True)

    pe = pe_ref[...].astype(jnp.float32)                            # (T, Dp)
    o_ref[...] = (gathered * scale + pe).astype(o_ref.dtype)


def text_embedding(x, token_table, pe_table, embed_scale=1.0):
    """Pallas equivalent of TextEmbedding.forward: token_embed(x) * scale + pe."""
    B, S = x.shape
    V, D = token_table.shape
    assert pe_table.shape == (S, D)

    tok_bytes = token_table.dtype.itemsize
    pe_bytes = pe_table.dtype.itemsize
    out_dtype = token_table.dtype
    out_bytes = jnp.dtype(out_dtype).itemsize

    # Pad feature dim to a lane multiple (lane-dense unmasked stores) and the vocab
    # to a lane multiple / multiple of the contraction chunk.
    Dp = _round_up(D, _LANE)
    Vp = _round_up(V, _LANE)
    if Vp > _V_CHUNK:
        Vp = _round_up(Vp, _V_CHUNK)

    # VMEM-resident one-hot gather path only (see TODO at top for huge vocabularies).
    assert Vp * Dp * tok_bytes <= 24 * 1024 * 1024, (
        "token table too large for the VMEM-resident one-hot gather path")

    # Matmul precision: f32 tables -> 3-pass HIGH (exact for a 0/1 selector),
    # 16-bit tables -> single native MXU pass.  The selector is built in the table
    # dtype (a bf16 selector would be promoted back to f32 by jnp.dot anyway).
    if token_table.dtype == jnp.float32:
        sel_dtype, precisions = jnp.float32, (lax.Precision.HIGH, lax.Precision.HIGHEST)
    else:
        sel_dtype, precisions = token_table.dtype, (lax.Precision.DEFAULT,)
    sel_bytes = jnp.dtype(sel_dtype).itemsize

    N = B * S
    T = _pick_token_tile(N, S, Vp, Dp, tok_bytes, pe_bytes, out_bytes, sel_bytes)

    # Padded tables (zero rows/cols are never selected: token ids < V).
    tok_p = token_table
    if (Vp, Dp) != (V, D):
        tok_p = jnp.zeros((Vp, Dp), token_table.dtype).at[:V, :D].set(token_table)
    pe_p = pe_table
    if Dp != D:
        pe_p = jnp.zeros((S, Dp), pe_table.dtype).at[:, :D].set(pe_table)

    # Flattened token ids, shaped (N, 1) so the in-kernel block broadcasts against the
    # lane iota with no transpose.
    # NOTE: out-of-range ids select no row (output = 0*scale + pe) rather than raising
    # like nn.Embedding; clamp in the caller if inputs are untrusted.
    ids = x.astype(jnp.int32).reshape(N, 1)

    pe_tilewise = (T % S == 0)
    if pe_tilewise:
        # Every tile spans whole sequences -> the (T, Dp) PE block is identical for
        # all tiles; pre-tile it and keep it resident (one DMA total).
        pe_arg = jnp.tile(pe_p, (T // S, 1))
    else:
        # S % T == 0: the PE block walks the table via its index_map; the per-step
        # (T, Dp) DMA pipelines behind the output writeback and keeps VMEM usage low.
        pe_arg = pe_p

    ws = _working_set_bytes(T, S, Vp, Dp, tok_bytes, pe_bytes, out_bytes, sel_bytes)
    vmem_limit = int(min(48 * 1024 * 1024, max(32 * 1024 * 1024, 3 * ws // 2)))

    cost = pl.CostEstimate(
        flops=2 * N * Vp * Dp,
        transcendentals=0,
        bytes_accessed=(N * 4 + Vp * Dp * tok_bytes
                        + pe_arg.shape[0] * Dp * pe_bytes + N * Dp * out_bytes))

    def build(precision, single_buffer_resident):
        kernel = functools.partial(
            _text_embedding_kernel, scale=float(embed_scale), sel_dtype=sel_dtype,
            precision=precision, v_chunk=_V_CHUNK)

        def resident_spec(shape):
            if single_buffer_resident:
                # Constant block index -> one buffer is enough; halves its VMEM cost.
                return pl.BlockSpec(shape, lambda i: (0, 0),
                                    pipeline_mode=pl.Buffered(1))
            return pl.BlockSpec(shape, lambda i: (0, 0))

        if pe_tilewise:
            pe_spec = resident_spec((T, Dp))
        else:
            pe_spec = pl.BlockSpec((T, Dp), lambda i: (i % (S // T), 0))

        return pl.pallas_call(
            kernel,
            out_shape=jax.ShapeDtypeStruct((N, Dp), out_dtype),
            grid=(N // T,),
            in_specs=[
                pl.BlockSpec((T, 1), lambda i: (i, 0)),   # token ids
                resident_spec((Vp, Dp)),                  # token-embedding table
                pe_spec,                                  # positional encodings
            ],
            out_specs=pl.BlockSpec((T, Dp), lambda i: (i, 0)),
            compiler_params=pltpu.CompilerParams(
                dimension_semantics=("parallel",),
                vmem_limit_bytes=vmem_limit),
            cost_estimate=cost,
        )

    # Attempt the fully-optimized configuration first; degrade gracefully if this
    # jax version rejects pl.Buffered(1) on a pallas_call BlockSpec or Precision.HIGH
    # in the TPU dot lowering (all fallbacks are numerically correct).
    out, last_err = None, None
    for precision in precisions:
        for single_buf in (True, False):
            try:
                out = build(precision, single_buf)(ids, tok_p, pe_arg)
                last_err = None
                break
            except Exception as e:  # noqa: BLE001 - fall through to next config
                last_err = e
        if out is not None:
            break
    if out is None:
        raise last_err

    out = out.reshape(B, S, Dp)
    if Dp != D:
        out = out[:, :, :D]
    return out


def sinusoidal_pe(S, D, dtype=jnp.float32):
    """Deterministic sinusoidal positional-encoding table [S, D]."""
    pos = jnp.arange(S, dtype=jnp.float32)[:, None]
    dim = jnp.arange(0, D, 2, dtype=jnp.float32)[None, :]
    inv_freq = jnp.exp(-jnp.log(10000.0) * dim / D)
    ang = pos * inv_freq                      # [S, D//2]
    pe = jnp.zeros((S, D), jnp.float32)
    pe = pe.at[:, 0::2].set(jnp.sin(ang))
    pe = pe.at[:, 1::2].set(jnp.cos(ang))
    return pe.astype(dtype)


if __name__ == "__main__":
    # Small shapes consistent with the module's forward: x [B, S] token ids.
    B, S, V, D = 2, 8, 32, 128
    embed_scale = 2.0

    key = jax.random.PRNGKey(0)
    k_tok, k_x = jax.random.split(key)

    token_table = (0.02 * jax.random.normal(k_tok, (V, D))).astype(jnp.float32)
    pe_table = sinusoidal_pe(S, D)
    x = jax.random.randint(k_x, (B, S), 0, V, dtype=jnp.int32)

    out = text_embedding(x, token_table, pe_table, embed_scale=embed_scale)
    out = jax.block_until_ready(out)

    # Pure-JAX reference: token_embed(x) * scale + pe.
    ref = token_table[x] * embed_scale + pe_table[None, :, :]
    assert out.shape == (B, S, D)
    # Precision.HIGH reconstructs the f32 rows exactly for a 0/1 selector; the
    # tolerance also covers a DEFAULT-precision fallback, while a wrong gather/PE row
    # would be off by ~1e-2..1, so this remains a strong check.
    assert jnp.allclose(out, ref, atol=1e-3, rtol=1e-3)

    print("KERNEL_OK")
</pallas_src>

<mosaic_0001>
module attributes {stable_mosaic.version = 11 : i64} {
  func.func @_text_embedding_kernel(%arg0: i32, %arg1: memref<16x1xi32, #tpu.memory_space<vmem>>, %arg2: memref<128x128xf32, #tpu.memory_space<vmem>>, %arg3: memref<16x128xf32, #tpu.memory_space<vmem>>, %arg4: memref<16x128xf32, #tpu.memory_space<vmem>>) attributes {dimension_semantics = [#tpu.dimension_semantics<parallel>], iteration_bounds = array<i64: 1>, scalar_prefetch = 0 : i64, scratch_operands = 0 : i64, tpu.core_type = #tpu.core_type<tc>, window_params = [{transform_indices = @transform_0, window_bounds = array<i64: 16, 1>}, {pipeline_mode = #tpu.pipeline_mode<synchronous>, transform_indices = @transform_1, window_bounds = array<i64: 128, 128>}, {pipeline_mode = #tpu.pipeline_mode<synchronous>, transform_indices = @transform_2, window_bounds = array<i64: 16, 128>}, {transform_indices = @transform_3, window_bounds = array<i64: 16, 128>}]} {
    %c0 = arith.constant 0 : index
    %c0_0 = arith.constant 0 : index
    %0 = vector.load %arg1[%c0, %c0_0] : memref<16x1xi32, #tpu.memory_space<vmem>>, vector<16x1xi32>
    %1 = tpu.iota {dimensions = array<i32: 1>} : vector<16x128xi32>
    %c0_i32 = arith.constant 0 : i32
    %2 = vector.broadcast %c0_i32 : i32 to vector<16x128xi32>
    %3 = arith.addi %1, %2 : vector<16x128xi32>
    %4 = vector.broadcast %0 : vector<16x1xi32> to vector<16x128xi32>
    %5 = arith.cmpi eq, %4, %3 : vector<16x128xi32>
    %6 = arith.extui %5 : vector<16x128xi1> to vector<16x128xi32>
    %7 = arith.sitofp %6 : vector<16x128xi32> to vector<16x128xf32>
    %c0_1 = arith.constant 0 : index
    %c0_2 = arith.constant 0 : index
    %8 = vector.load %arg2[%c0_1, %c0_2] : memref<128x128xf32, #tpu.memory_space<vmem>>, vector<128x128xf32>
    %cst = arith.constant dense<0.000000e+00> : vector<16x128xf32>
    %9 = tpu.matmul %7, %8, %cst {dimension_numbers = #tpu.dot_dimension_numbers<[1], [0], [0], [1], [0, 0, 1, 1], [], []>, precision = #tpu.contract_precision<fp32>} : vector<16x128xf32>, vector<128x128xf32>, vector<16x128xf32> -> vector<16x128xf32>
    %c0_3 = arith.constant 0 : index
    %c0_4 = arith.constant 0 : index
    %10 = vector.load %arg3[%c0_3, %c0_4] : memref<16x128xf32, #tpu.memory_space<vmem>>, vector<16x128xf32>
    %cst_5 = arith.constant 2.000000e+00 : f32
    %11 = vector.broadcast %cst_5 : f32 to vector<16x128xf32>
    %12 = arith.mulf %9, %11 : vector<16x128xf32>
    %13 = arith.addf %12, %10 : vector<16x128xf32>
    %c0_6 = arith.constant 0 : index
    %c0_7 = arith.constant 0 : index
    %14 = vector.load %arg4[%c0_6, %c0_7] : memref<16x128xf32, #tpu.memory_space<vmem>>, vector<16x128xf32>
    tpu.vector_store %arg4[%c0_6, %c0_7], %13 {strides = array<i32>} : memref<16x128xf32, #tpu.memory_space<vmem>>, vector<16x128xf32>,
    return
  }
  func.func @transform_0(%arg0: i32) -> (i32, i32) {
    %c0_i32 = arith.constant 0 : i32
    %c0_i32_0 = arith.constant 0 : i32
    return %arg0, %c0_i32 : i32, i32
  }
  func.func @transform_1(%arg0: i32) -> (i32, i32) {
    %c0_i32 = arith.constant 0 : i32
    %c0_i32_0 = arith.constant 0 : i32
    %c0_i32_1 = arith.constant 0 : i32
    return %c0_i32, %c0_i32_0 : i32, i32
  }
  func.func @transform_2(%arg0: i32) -> (i32, i32) {
    %c0_i32 = arith.constant 0 : i32
    %c0_i32_0 = arith.constant 0 : i32
    %c0_i32_1 = arith.constant 0 : i32
    return %c0_i32, %c0_i32_0 : i32, i32
  }
  func.func @transform_3(%arg0: i32) -> (i32, i32) {
    %c0_i32 = arith.constant 0 : i32
    %c0_i32_0 = arith.constant 0 : i32
    return %arg0, %c0_i32 : i32, i32
  }
}

module attributes {stable_mosaic.version = 11 : i64} {
  func.func @_text_embedding_kernel(%arg0: i32, %arg1: memref<16x1xi32, #tpu.memory_space<vmem>>, %arg2: memref<128x128xf32, #tpu.memory_space<vmem>>, %arg3: memref<16x128xf32, #tpu.memory_space<vmem>>, %arg4: memref<16x128xf32, #tpu.memory_space<vmem>>) attributes {dimension_semantics = [#tpu.dimension_semantics<parallel>], iteration_bounds = array<i64: 1>, scalar_prefetch = 0 : i64, scratch_operands = 0 : i64, tpu.core_type = #tpu.core_type<tc>, window_params = [{transform_indices = @transform_0, window_bounds = array<i64: 16, 1>}, {pipeline_mode = #tpu.pipeline_mode<synchronous>, transform_indices = @transform_1, window_bounds = array<i64: 128, 128>}, {pipeline_mode = #tpu.pipeline_mode<synchronous>, transform_indices = @transform_2, window_bounds = array<i64: 16, 128>}, {transform_indices = @transform_3, window_bounds = array<i64: 16, 128>}]} {
    %c0 = arith.constant 0 : index
    %c0_0 = arith.constant 0 : index
    %0 = vector.load %arg1[%c0, %c0_0] : memref<16x1xi32, #tpu.memory_space<vmem>>, vector<16x1xi32>
    %1 = tpu.iota {dimensions = array<i32: 1>} : vector<16x128xi32>
    %c0_i32 = arith.constant 0 : i32
    %2 = vector.broadcast %c0_i32 : i32 to vector<16x128xi32>
    %3 = arith.addi %1, %2 : vector<16x128xi32>
    %4 = vector.broadcast %0 : vector<16x1xi32> to vector<16x128xi32>
    %5 = arith.cmpi eq, %4, %3 : vector<16x128xi32>
    %6 = arith.extui %5 : vector<16x128xi1> to vector<16x128xi32>
    %7 = arith.sitofp %6 : vector<16x128xi32> to vector<16x128xf32>
    %c0_1 = arith.constant 0 : index
    %c0_2 = arith.constant 0 : index
    %8 = vector.load %arg2[%c0_1, %c0_2] : memref<128x128xf32, #tpu.memory_space<vmem>>, vector<128x128xf32>
    %cst = arith.constant dense<0.000000e+00> : vector<16x128xf32>
    %9 = tpu.matmul %7, %8, %cst {dimension_numbers = #tpu.dot_dimension_numbers<[1], [0], [0], [1], [0, 0, 1, 1], [], []>, precision = #tpu.contract_precision<fp32>} : vector<16x128xf32>, vector<128x128xf32>, vector<16x128xf32> -> vector<16x128xf32>
    %c0_3 = arith.constant 0 : index
    %c0_4 = arith.constant 0 : index
    %10 = vector.load %arg3[%c0_3, %c0_4] : memref<16x128xf32, #tpu.memory_space<vmem>>, vector<16x128xf32>
    %cst_5 = arith.constant 2.000000e+00 : f32
    %11 = vector.broadcast %cst_5 : f32 to vector<16x128xf32>
    %12 = arith.mulf %9, %11 : vector<16x128xf32>
    %13 = arith.addf %12, %10 : vector<16x128xf32>
    %c0_6 = arith.constant 0 : index
    %c0_7 = arith.constant 0 : index
    %14 = vector.load %arg4[%c0_6, %c0_7] : memref<16x128xf32, #tpu.memory_space<vmem>>, vector<16x128xf32>
    tpu.vector_store %arg4[%c0_6, %c0_7], %13 {strides = array<i32>} : memref<16x128xf32, #tpu.memory_space<vmem>>, vector<16x128xf32>,
    return
  }
  func.func @transform_0(%arg0: i32) -> (i32, i32) {
    %c0_i32 = arith.constant 0 : i32
    %c0_i32_0 = arith.constant 0 : i32
    return %arg0, %c0_i32 : i32, i32
  }
  func.func @transform_1(%arg0: i32) -> (i32, i32) {
    %c0_i32 = arith.constant 0 : i32
    %c0_i32_0 = arith.constant 0 : i32
    %c0_i32_1 = arith.constant 0 : i32
    return %c0_i32, %c0_i32_0 : i32, i32
  }
  func.func @transform_2(%arg0: i32) -> (i32, i32) {
    %c0_i32 = arith.constant 0 : i32
    %c0_i32_0 = arith.constant 0 : i32
    %c0_i32_1 = arith.constant 0 : i32
    return %c0_i32, %c0_i32_0 : i32, i32
  }
  func.func @transform_3(%arg0: i32) -> (i32, i32) {
    %c0_i32 = arith.constant 0 : i32
    %c0_i32_0 = arith.constant 0 : i32
    return %arg0, %c0_i32 : i32, i32
  }
}

</mosaic_0001>

<bundles_post_ra>
// kernel: tpu_custom_call.1
= control target key start
LH: loop header
LB: loop body
LE: loop exit
PB: predicated region body
PF: predicated region fallthrough
CT: control target
= control target key end

     0   :  { %8 = vsyncpa [#allocation3], 0  ;;  %s1679_s0 = inlined_call_operand.vmem [shape: s32[16,1], index: 0, kind: input, shape index: {}]   ;;  %s1680_s1 = inlined_call_operand.hbm [shape: f32[128,128], index: 1, kind: input, shape index: {}]   ;;  %s1681_s2 = inlined_call_operand.vmem [shape: f32[16,128], index: 2, kind: input, shape index: {}]   ;;  %s1682_s3 = inlined_call_operand.hbm [shape: f32[16,128], index: 3, kind: output, shape index: {}]  }
   0x1   :  { %9 = vsyncpa [#allocation4], 0  ;;  %s1354_s12 = smov [#allocation2]   ;;  %s1306_s16 = scalar_lea.hbm %s1680_s1, 2048 }
   0x2   :  { %s17_s13 = sshll.u32 %s1354_s12, 4  ;;  %p1307_p0 = scmp.ne.s32.totalorder %s1680_s1, %s1306_s16  ;;  %s18_s13 = int_to_ptr.vmem [resolvable:$true] %s17_s13 }
   0x3   :  { %p1310_p1 = scmp.lt.u32.totalorder %s1306_s16, %s1680_s1 }
   0x5   :  { %p1312_p2 = pnand %p1310_p1, %p1307_p0 }
   0x7   :  { %1315 = shalt.err (!%p1312_p2)
}
   0x8   :  { %s1316_s21 = scalar_lea.vmem %s18_s13, 2048  ;;  %p1321_p4 = scmp.lt.s32.totalorder %s18_s13, %s18_s13 }
   0x9   :  { %p1317_p3 = scmp.ne.s32.totalorder %s18_s13, %s1316_s21  ;;  %p1322_p5 = scmp.lt.s32.totalorder %s1316_s21, %s1316_s21 }
   0xb   :  { %p1323_p6 = por %p1322_p5, %p1321_p4 }
   0xd   :  { %p1324_p7 = pnand %p1323_p6, %p1317_p3 }
   0xf   :  { %1327 = shalt.err (!%p1324_p7)
}
  0x10   :  { %s1355_s22 = smov 128   ;;  %s1356_s23 = smov 8  }
  0x11   :  { %23 = dma.hbm_to_vmem [thread:$0]  %s1680_s1, 2048, %s18_s13, [#allocation3], %s1355_s22, %s1355_s22, %s1356_s23  }
  0x12   :  { %1350 = dma.done.wait [#allocation3], 2048  }
  0x13   :  { %1351 = vsyncadd [#allocation3], 4294965248  ;;  %v1357_v0 = vmov 0   ;;  %v29_v1 = vld [vmem:[%s1679_s0] sm:$0xff]  ;;  %v46_v3 = vld [vmem:[#allocation2 + $0x8] sm:$0xff]  ;;  %s1360_s5 = smov [#allocation5]  }
  0x14   :  { %1305 = vset.pattern.permute.xlu0 %v1357_v0  ;;  %v45_v2 = vld [vmem:[#allocation2] sm:$0xff]  ;;  %v47_v5 = vld [vmem:[#allocation2 + $0x10] sm:$0xff]  ;;  %v48_v6 = vld [vmem:[#allocation2 + $0x18] sm:$0xff]  ;;  %v65_v8 = vand.u32 4294901760, %v46_v3  ;;  %s758_s6 = sshll.u32 %s1360_s5, 4  ;;  %s759_s6 = int_to_ptr.vmem [resolvable:$true] %s758_s6 }
  0x15   :  { %34 = vperm.xlu0 %1305, %v29_v1   ;;  %v62_v4 = vand.u32 4294901760, %v45_v2  ;;  %v30_v7 = vld [vmem:[%s1679_s0 + $0x8] sm:$0xff]  ;;  %v68_v9 = vand.u32 4294901760, %v47_v5  ;;  %v71_v10 = vand.u32 4294901760, %v48_v6  ;;  %v49_v11 = vld [vmem:[#allocation2 + $0x20] sm:$0xff]  ;;  %v51_v17 = vld [vmem:[#allocation2 + $0x30] sm:$0xff]  ;;  %p1333_p9 = scmp.lt.s32.totalorder %s759_s6, %s759_s6 }
  0x16   :  { %v50_v12 = vld [vmem:[#allocation2 + $0x28] sm:$0xff]  ;;  %v74_v15 = vand.u32 4294901760, %v49_v11  ;;  %v52_v18 = vld [vmem:[#allocation2 + $0x38] sm:$0xff]  ;;  %v80_v20 = vand.u32 4294901760, %v51_v17  ;;  %v53_v22 = vld [vmem:[#allocation2 + $0x40] sm:$0xff]  ;;  %v1452_v46 = vsub.f32 %v46_v3, %v65_v8  ;;  %s1328_s7 = scalar_lea.vmem %s759_s6, 256 }
  0x17   :  { %v1402_v13 = vpack.c.bf16 %v65_v8, %v62_v4  ;;  %v1404_v14 = vpack.c.bf16 %v71_v10, %v68_v9  ;;  %v77_v16 = vand.u32 4294901760, %v50_v12  ;;  %v83_v21 = vand.u32 4294901760, %v52_v18  ;;  %v54_v23 = vld [vmem:[#allocation2 + $0x48] sm:$0xff]  ;;  %v1420_v28 = vld [vmem:[#allocation2 + $0x50] sm:$0xff]  ;;  %v1428_v32 = vld [vmem:[#allocation2 + $0x58] sm:$0xff]  ;;  %p1329_p8 = scmp.ne.s32.totalorder %s759_s6, %s1328_s7  ;;  %p1334_p10 = scmp.lt.s32.totalorder %s1328_s7, %s1328_s7 }
  0x18   :  { %v1414_v24 = vsub.f32 %v47_v5, %v68_v9  ;;  %v1416_v25 = vsub.f32 %v48_v6, %v71_v10  ;;  %v86_v26 = vand.u32 4294901760, %v53_v22  ;;  %v89_v27 = vand.u32 4294901760, %v54_v23  ;;  %v1444_v41 = vld [vmem:[#allocation2 + $0x60] sm:$0xff]  ;;  %v1448_v44 = vld [vmem:[#allocation2 + $0x68] sm:$0xff]  ;;  %v1472_v58 = vld [vmem:[#allocation2 + $0x70] sm:$0xff] }
  0x19   :  { %37 = vperm.xlu0 %1305, %v30_v7   ;;  %1193 = vmatprep.subr.bf16.mxu0 %v1402_v13  ;;  %v1412_v19 = vpack.c.bf16 %v77_v16, %v74_v15  ;;  %v1426_v31 = vpack.c.bf16 %v83_v21, %v80_v20  ;;  %v92_v36 = vand.u32 4294901760, %v1420_v28  ;;  %v1435_v37 = vsub.f32 %v49_v11, %v74_v15  ;;  %v60_v61 = vld [vmem:[#allocation2 + $0x78] sm:$0xff]  ;;  %p1335_p11 = por %p1334_p10, %p1333_p9 }
  0x1a   :  { %1097 = vmatprep.subr.bf16.mxu1 %v1402_v13  ;;  %1195 = vmatpush3.bf16.msra.mxu0 %v1402_v13  ;;  %v179_v29 = vand.u32 4294901760, %v1414_v24  ;;  %v186_v30 = vand.u32 4294901760, %v1416_v25  ;;  %v1437_v38 = vsub.f32 %v50_v12, %v77_v16  ;;  %v1441_v39 = vpack.c.bf16 %v89_v27, %v86_v26 }
  0x1b   :  { %1099 = vmatpush3.bf16.msra.mxu1 %v1402_v13  ;;  %1197 = vmatprep.subr.bf16.mxu0 %v1404_v14  ;;  %v95_v40 = vand.u32 4294901760, %v1428_v32  ;;  %v1450_v45 = vsub.f32 %v45_v2, %v62_v4  ;;  %v193_v47 = vand.u32 4294901760, %v1435_v37  ;;  %v1458_v50 = vsub.f32 %v51_v17, %v80_v20  ;;  %p1336_p12 = pnand %p1335_p11, %p1329_p8 }
  0x1c   :  { %1101 = vmatprep.subr.bf16.mxu1 %v1404_v14  ;;  %v1430_v33 = vpack.c.bf16 %v186_v30, %v179_v29  ;;  %v180_v34 = vsub.f32 %v1414_v24, %v179_v29  ;;  %v187_v35 = vsub.f32 %v1416_v25, %v186_v30  ;;  %v200_v48 = vand.u32 4294901760, %v1437_v38 }
  0x1d   :  { %v1460_v51 = vsub.f32 %v52_v18, %v83_v21  ;;  %v98_v52 = vand.u32 4294901760, %v1444_v41  ;;  %v194_v54 = vsub.f32 %v1435_v37, %v193_v47  ;;  %v1469_v56 = vpack.c.bf16 %v95_v40, %v92_v36 }
  0x1e   :  { %1199 = vmatpush3.bf16.msra.mxu0 %v1404_v14  ;;  %v181_v42 = vand.u32 4294901760, %v180_v34  ;;  %v188_v43 = vand.u32 4294901760, %v187_v35  ;;  %v1463_v53 = vpack.c.bf16 %v200_v48, %v193_v47  ;;  %v201_v55 = vsub.f32 %v1437_v38, %v200_v48 }
  0x1f   :  { %1103 = vmatpush3.bf16.msra.mxu1 %v1404_v14  ;;  %1201 = vmatprep.subr.bf16.mxu0 %v1412_v19  ;;  %v101_v57 = vand.u32 4294901760, %v1448_v44  ;;  %v207_v59 = vand.u32 4294901760, %v1458_v50  ;;  %v214_v60 = vand.u32 4294901760, %v1460_v51  ;;  %v165_v62 = vand.u32 4294901760, %v1450_v45 }
  0x20   :  { %1105 = vmatprep.subr.bf16.mxu1 %v1412_v19  ;;  %v1456_v49 = vpack.c.bf16 %v188_v43, %v181_v42  ;;  %v172_v63 = vand.u32 4294901760, %v1452_v46  ;;  %v195_v0 = vand.u32 4294901760, %v194_v54  ;;  %v202_v1 = vand.u32 4294901760, %v201_v55 }
  0x21   :  { %v1480_v2 = vpack.c.bf16 %v214_v60, %v207_v59  ;;  %v208_v3 = vsub.f32 %v1458_v50, %v207_v59  ;;  %v215_v4 = vsub.f32 %v1460_v51, %v214_v60  ;;  %v1484_v5 = vsub.f32 %v53_v22, %v86_v26 }
  0x22   :  { %1203 = vmatpush3.bf16.msra.mxu0 %v1412_v19  ;;  %v104_v6 = vand.u32 4294901760, %v1472_v58  ;;  %v1487_v7 = vpack.c.bf16 %v202_v1, %v195_v0  ;;  %v1489_v8 = vsub.f32 %v54_v23, %v89_v27  ;;  %v107_v9 = vand.u32 4294901760, %v60_v61 }
  0x23   :  { %1107 = vmatpush3.bf16.msra.mxu1 %v1412_v19  ;;  %1205 = vmatprep.subr.bf16.mxu0 %v1426_v31  ;;  %v209_v10 = vand.u32 4294901760, %v208_v3  ;;  %v216_v11 = vand.u32 4294901760, %v215_v4  ;;  %v221_v12 = vand.u32 4294901760, %v1484_v5  ;;  %v1496_v15 = vpack.c.bf16 %v101_v57, %v98_v52 }
  0x24   :  { %1109 = vmatprep.subr.bf16.mxu1 %v1426_v31  ;;  %v166_v16 = vsub.f32 %v1450_v45, %v165_v62  ;;  %v173_v17 = vsub.f32 %v1452_v46, %v172_v63  ;;  %v228_v18 = vand.u32 4294901760, %v1489_v8  ;;  %v234_v22 = vsub.f32 %v1420_v28, %v92_v36 }
  0x25   :  { %v1501_v20 = vpack.c.bf16 %v216_v11, %v209_v10  ;;  %v222_v21 = vsub.f32 %v1484_v5, %v221_v12  ;;  %v241_v23 = vsub.f32 %v1428_v32, %v95_v40  ;;  %v1513_v35 = vpack.c.bf16 %v107_v9, %v104_v6 }
  0x26   :  { %1207 = vmatpush3.bf16.msra.mxu0 %v1426_v31  ;;  %v1506_v26 = vpack.c.bf16 %v228_v18, %v221_v12  ;;  %v229_v27 = vsub.f32 %v1489_v8, %v228_v18  ;;  %v235_v30 = vand.u32 4294901760, %v234_v22  ;;  %v167_v28 = vand.u32 4294901760, %v166_v16 }
  0x27   :  { %1111 = vmatpush3.bf16.msra.mxu1 %v1426_v31  ;;  %1209 = vmatprep.subr.bf16.mxu0 %v1441_v39  ;;  %v223_v29 = vand.u32 4294901760, %v222_v21  ;;  %v242_v34 = vand.u32 4294901760, %v241_v23  ;;  %v174_v36 = vand.u32 4294901760, %v173_v17  ;;  %v248_v47 = vsub.f32 %v1444_v41, %v98_v52 }
  0x28   :  { %1113 = vmatprep.subr.bf16.mxu1 %v1441_v39  ;;  %v230_v32 = vand.u32 4294901760, %v229_v27  ;;  %v236_v42 = vsub.f32 %v234_v22, %v235_v30  ;;  %v255_v54 = vsub.f32 %v1448_v44, %v101_v57  ;;  %v1224_v0 = vpack.c.bf16 %v172_v63, %v165_v62 }
  0x29   :  { %v1515_v40 = vpack.c.bf16 %v242_v34, %v235_v30  ;;  %v243_v43 = vsub.f32 %v241_v23, %v242_v34  ;;  %v249_v60 = vand.u32 4294901760, %v248_v47  ;;  %v1128_v1 = vpack.c.bf16 %v174_v36, %v167_v28 }
  0x2a   :  { %1211 = vmatpush3.bf16.msra.mxu0 %v1441_v39  ;;  %v1518_v48 = vpack.c.bf16 %v230_v32, %v223_v29  ;;  %v237_v55 = vand.u32 4294901760, %v236_v42  ;;  %v256_v3 = vand.u32 4294901760, %v255_v54  ;;  %v262_v52 = vsub.f32 %v1472_v58, %v104_v6 }
  0x2b   :  { %1115 = vmatpush3.bf16.msra.mxu1 %v1441_v39  ;;  %1213 = vmatprep.subr.bf16.mxu0 %v1469_v56  ;;  %v244_v59 = vand.u32 4294901760, %v243_v43  ;;  %v250_v41 = vsub.f32 %v248_v47, %v249_v60  ;;  %v269_v44 = vsub.f32 %v60_v61, %v107_v9  ;;  %v1538_v9 = vpack.c.bf16 %v1452_v46, %v1450_v45 }
  0x2c   :  { %1117 = vmatprep.subr.bf16.mxu1 %v1469_v56  ;;  %v1528_v57 = vpack.c.bf16 %v256_v3, %v249_v60  ;;  %v257_v10 = vsub.f32 %v255_v54, %v256_v3  ;;  %v263_v12 = vand.u32 4294901760, %v262_v52  ;;  %v1542_v27 = vpack.c.bf16 %v1416_v25, %v1414_v24 }
  0x2d   :  { %v1525_v4 = vpack.c.bf16 %v244_v59, %v237_v55  ;;  %v251_v11 = vand.u32 4294901760, %v250_v41  ;;  %v270_v16 = vand.u32 4294901760, %v269_v44  ;;  %v1546_v29 = vpack.c.bf16 %v1437_v38, %v1435_v37 }
  0x2e   :  { %1215 = vmatpush3.bf16.msra.mxu0 %v1469_v56  ;;  %v258_v62 = vand.u32 4294901760, %v257_v10  ;;  %v264_v17 = vsub.f32 %v262_v52, %v263_v12  ;;  %v1550_v30 = vpack.c.bf16 %v1460_v51, %v1458_v50  ;;  %v1554_v34 = vpack.c.bf16 %v1489_v8, %v1484_v5 }
  0x2f   :  { %1119 = vmatpush3.bf16.msra.mxu1 %v1469_v56  ;;  %1217 = vmatprep.subr.bf16.mxu0 %v1496_v15  ;;  %v1532_v63 = vpack.c.bf16 %v270_v16, %v263_v12  ;;  %v271_v18 = vsub.f32 %v269_v44, %v270_v16  ;;  %v1556_v28 = vpack.c.bf16 %v241_v23, %v234_v22  ;;  %v31_v24 = vlaneseq }
  0x30   :  { %1121 = vmatprep.subr.bf16.mxu1 %v1496_v15  ;;  %v1152_v21 = vpack.c.bf16 %v258_v62, %v251_v11  ;;  %v265_v58 = vand.u32 4294901760, %v264_v17  ;;  %v1558_v45 = vpack.c.bf16 %v255_v54, %v248_v47  ;;  %v1560_v46 = vpack.c.bf16 %v269_v44, %v262_v52 }
  0x31   :  { %v272_v61 = vand.u32 4294901760, %v271_v18  ;;  %v1562_v25 = vand.u32 127, %v31_v24  ;;  %v1358_v37 = vmov 0.0   ;;  %v1359_v47 = vmov 1.0  }
  0x32   :  { %1219 = vmatpush3.bf16.msra.mxu0 %v1496_v15 }
  0x33   :  { %1123 = vmatpush3.bf16.msra.mxu1 %v1496_v15  ;;  %1221 = vmatprep.subr.bf16.mxu0 %v1513_v35  ;;  %v1534_v6 = vpack.c.bf16 %v272_v61, %v265_v58 }
  0x34   :  { %1125 = vmatprep.subr.bf16.mxu1 %v1513_v35 }
  0x36   :  { %1223 = vmatpush3.bf16.msra.mxu0 %v1513_v35 }
  0x37   :  { %1127 = vmatpush3.bf16.msra.mxu1 %v1513_v35  ;;  %1225 = vmatprep.subr.bf16.mxu0 %v1224_v0 }
  0x38   :  { %1129 = vmatprep.subr.bf16.mxu1 %v1128_v1 }
  0x94   :  { %v35_v36 = vpop.permute.xlu0 %34 }
  0x95   :  { %vm39_vm0 = vcmp.eq.s32.totalorder %v35_v36, %v1562_v25 }
  0x96   :  { %v770_v38 = vsel %vm39_vm0, 1.0, %v1358_v37 }
  0x97   :  { %v143_v50 = vsub.f32 %v770_v38, %v770_v38 }
  0x98   :  { %v1567_v51 = vpop.permute.xlu0 %37 }
  0x99   :  { %vm40_vm1 = vcmp.eq.s32.totalorder %v1567_v51, %v1562_v25  ;;  %v144_v5 = vand.u32 4294901760, %v143_v50 }
  0x9a   :  { %v771_v8 = vsel %vm40_vm1, 1.0, %v1358_v37 }
  0x9b   :  { %v1574_v22 = vsub.f32 %v771_v8, %v771_v8  ;;  %1023 = vmatprep.mubr.f32.mxu0 %v144_v5  ;;  %v145_v23 = vsub.f32 %v143_v50, %v144_v5 }
  0x9d   :  { %v146_v32 = vand.u32 4294901760, %v145_v23  ;;  %v154_v42 = vand.u32 4294901760, %v1574_v22 }
  0x9f   :  { %918 = vmatprep.mubr.f32.mxu1 %v146_v32  ;;  %1024 = vmatmul.mubr.f32.vlgmr.msra.gmra.mrb[0].mxu0 %v154_v42  ;;  %v155_v43 = vsub.f32 %v1574_v22, %v154_v42 }
  0xa0   :  { %1227 = vmatpush3.bf16.msra.mxu0 %v1224_v0  ;;  %1058 = vmatprep.mubr.msk.f32.mxu0 %vm39_vm0, %v1359_v47 }
  0xa1   :  { %1229 = vmatprep.subr.bf16.mxu0 %v1430_v33  ;;  %v156_v54 = vand.u32 4294901760, %v155_v43 }
  0xa3   :  { %919 = vmatmul.mubr.f32.vlgmr.msra.gmra.mrb[0].mxu1 %v156_v54 }
  0xa4   :  { %1131 = vmatpush3.bf16.msra.mxu1 %v1128_v1  ;;  %1231 = vmatpush3.bf16.msra.mxu0 %v1430_v33 }
  0xa5   :  { %953 = vmatprep.mubr.msk.f32.mxu1 %vm39_vm0, %v1359_v47  ;;  %1133 = vmatprep.subr.bf16.mxu1 %v1456_v49 }
  0xa6   :  { %1233 = vmatprep.subr.bf16.mxu0 %v1463_v53 }
  0xa8   :  { %1135 = vmatpush3.bf16.msra.mxu1 %v1456_v49  ;;  %1235 = vmatpush3.bf16.msra.mxu0 %v1463_v53 }
  0xa9   :  { %1137 = vmatprep.subr.bf16.mxu1 %v1487_v7  ;;  %1237 = vmatprep.subr.bf16.mxu0 %v1480_v2 }
  0xac   :  { %1139 = vmatpush3.bf16.msra.mxu1 %v1487_v7  ;;  %1239 = vmatpush3.bf16.msra.mxu0 %v1480_v2 }
  0xad   :  { %1141 = vmatprep.subr.bf16.mxu1 %v1501_v20  ;;  %1241 = vmatprep.subr.bf16.mxu0 %v1506_v26 }
  0xb0   :  { %1143 = vmatpush3.bf16.msra.mxu1 %v1501_v20  ;;  %1243 = vmatpush3.bf16.msra.mxu0 %v1506_v26 }
  0xb1   :  { %1145 = vmatprep.subr.bf16.mxu1 %v1518_v48  ;;  %1245 = vmatprep.subr.bf16.mxu0 %v1515_v40 }
  0xb4   :  { %1147 = vmatpush3.bf16.msra.mxu1 %v1518_v48  ;;  %1247 = vmatpush3.bf16.msra.mxu0 %v1515_v40 }
  0xb5   :  { %1149 = vmatprep.subr.bf16.mxu1 %v1525_v4  ;;  %1249 = vmatprep.subr.bf16.mxu0 %v1528_v57 }
  0xb8   :  { %1151 = vmatpush3.bf16.msra.mxu1 %v1525_v4  ;;  %1251 = vmatpush3.bf16.msra.mxu0 %v1528_v57 }
  0xb9   :  { %1153 = vmatprep.subr.bf16.mxu1 %v1152_v21  ;;  %1253 = vmatprep.subr.bf16.mxu0 %v1532_v63 }
  0xbc   :  { %1155 = vmatpush3.bf16.msra.mxu1 %v1152_v21  ;;  %1255 = vmatpush3.bf16.msra.mxu0 %v1532_v63 }
  0xbd   :  { %1157 = vmatprep.subr.bf16.mxu1 %v1534_v6  ;;  %1257 = vmatprep.subr.bf16.mxu0 %v1402_v13 }
  0xbf   :  { %1059 = vmatmul.mubr.msk.f32.vlgmr.msra.gmra.mrb[0].mxu0 %vm40_vm1, %v1359_v47 }
  0xc0   :  { %1159 = vmatpush3.bf16.msra.mxu1 %v1534_v6  ;;  %1259 = vmatpush3.bf16.msra.mxu0 %v1402_v13 }
  0xc1   :  { %1093 = vmatprep.mubr.msk.f32.mxu0 %vm39_vm0, %v1359_v47  ;;  %1161 = vmatprep.subr.bf16.mxu1 %v1538_v9 }
  0xc2   :  { %1261 = vmatprep.subr.bf16.mxu0 %v1404_v14 }
  0xc3   :  { %954 = vmatmul.mubr.msk.f32.vlgmr.msra.gmra.mrb[0].mxu1 %vm40_vm1, %v1359_v47 }
  0xc4   :  { %1163 = vmatpush3.bf16.msra.mxu1 %v1538_v9  ;;  %988 = vmatprep.mubr.f32.mxu1 %v143_v50 }
  0xc5   :  { %1263 = vmatpush3.bf16.msra.mxu0 %v1404_v14  ;;  %1165 = vmatprep.subr.bf16.mxu1 %v1542_v27 }
  0xc6   :  { %1265 = vmatprep.subr.bf16.mxu0 %v1412_v19 }
  0xc8   :  { %1167 = vmatpush3.bf16.msra.mxu1 %v1542_v27 }
  0xc9   :  { %1267 = vmatpush3.bf16.msra.mxu0 %v1412_v19  ;;  %1169 = vmatprep.subr.bf16.mxu1 %v1546_v29 }
  0xca   :  { %1269 = vmatprep.subr.bf16.mxu0 %v1426_v31 }
  0xcc   :  { %1171 = vmatpush3.bf16.msra.mxu1 %v1546_v29 }
  0xcd   :  { %1271 = vmatpush3.bf16.msra.mxu0 %v1426_v31  ;;  %1173 = vmatprep.subr.bf16.mxu1 %v1550_v30 }
  0xce   :  { %1273 = vmatprep.subr.bf16.mxu0 %v1441_v39 }
  0xd0   :  { %1175 = vmatpush3.bf16.msra.mxu1 %v1550_v30 }
  0xd1   :  { %1275 = vmatpush3.bf16.msra.mxu0 %v1441_v39  ;;  %1177 = vmatprep.subr.bf16.mxu1 %v1554_v34  ;;  %v746_v39 = vld [vmem:[%s1681_s2 + $0x8] sm:$0xff] }
  0xd2   :  { %1277 = vmatprep.subr.bf16.mxu0 %v1469_v56 }
  0xd4   :  { %1179 = vmatpush3.bf16.msra.mxu1 %v1554_v34 }
  0xd5   :  { %1279 = vmatpush3.bf16.msra.mxu0 %v1469_v56  ;;  %1181 = vmatprep.subr.bf16.mxu1 %v1556_v28  ;;  %v745_v56 = vld [vmem:[%s1681_s2] sm:$0xff] }
  0xd6   :  { %1281 = vmatprep.subr.bf16.mxu0 %v1496_v15 }
  0xd8   :  { %1183 = vmatpush3.bf16.msra.mxu1 %v1556_v28 }
  0xd9   :  { %1283 = vmatpush3.bf16.msra.mxu0 %v1496_v15  ;;  %1185 = vmatprep.subr.bf16.mxu1 %v1558_v45 }
  0xda   :  { %1285 = vmatprep.subr.bf16.mxu0 %v1513_v35 }
  0xdc   :  { %1187 = vmatpush3.bf16.msra.mxu1 %v1558_v45 }
  0xdd   :  { %1287 = vmatpush3.bf16.msra.mxu0 %v1513_v35  ;;  %1189 = vmatprep.subr.bf16.mxu1 %v1560_v46 }
  0xe0   :  { %1094 = vmatmul.mubr.msk.f32.vlgmr.msra.gmra.mrb[0].mxu0 %vm40_vm1, %v1359_v47  ;;  %1191 = vmatpush3.bf16.msra.mxu1 %v1560_v46 }
  0xe3   :  { %989 = vmatmul.mubr.f32.vlgmr.msra.gmra.mrb[0].mxu1 %v1574_v22 }
 0x1b3   :  { %v1095_v13 = vpop.f32.mrb[0].mxu0 }
 0x1b4   :  { %v735_v14 = vpop.f32.mrb[1].mxu0 }
 0x1b6   :  { %v990_v19 = vpop.f32.mrb[0].mxu1 }
 0x1b7   :  { %v1288_v31 = vadd.f32 %v1095_v13, %v990_v19  ;;  %v419_v33 = vpop.f32.mrb[1].mxu1 }
 0x1b8   :  { %v1289_v49 = vadd.f32 %v735_v14, %v419_v33 }
 0x1b9   :  { %v748_v53 = vmul.f32 2.0, %v1288_v31 }
 0x1ba   :  { %v747_v2 = vmul.f32 2.0, %v1289_v49 }
 0x1bb   :  { %v750_v7 = vadd.f32 %v748_v53, %v746_v39 }
 0x1bc   :  { %v749_v15 = vadd.f32 %v747_v2, %v745_v56 }
 0x1bd   :  { %752 = vst [vmem:[#allocation5 + $0x8] sm:$0xff] %v750_v7 }
 0x1be   :  { %751 = vst [vmem:[#allocation5] sm:$0xff] %v749_v15 }
 0x1bf   :  { %1339 = shalt.err (!%p1336_p12)
}
 0x1c0   :  { %s1340_s10 = scalar_lea.hbm %s1682_s3, 256 }
 0x1c1   :  { %p1341_p13 = scmp.ne.s32.totalorder %s1682_s3, %s1340_s10  ;;  %p1344_p0 = scmp.lt.u32.totalorder %s1340_s10, %s1682_s3 }
 0x1c3   :  { %p1346_p1 = pnand %p1344_p0, %p1341_p13 }
 0x1c5   :  { %1349 = shalt.err (!%p1346_p1)
}
 0x1c6   :  { %764 = dma.vmem_to_hbm [thread:$0]  %s759_s6, 256, %s1682_s3, [#allocation4], %s1355_s22, %s1355_s22, %s1356_s23  }
 0x1c7   :  { %1352 = dma.done.wait [#allocation4], 256  }
 0x1c8   :  { %1353 = vsyncadd [#allocation4], 4294967040 }
 0x1c9   :  { %768 = vsyncpa [#allocation3], 1 }
 0x1ca   :  { %769 = vsyncpa [#allocation4], 1 }

// kernel: tpu_custom_call.1
= control target key start
LH: loop header
LB: loop body
LE: loop exit
PB: predicated region body
PF: predicated region fallthrough
CT: control target
= control target key end

     0   :  { %8 = vsyncpa [#allocation3], 0  ;;  %s1679_s0 = inlined_call_operand.vmem [shape: s32[16,1], index: 0, kind: input, shape index: {}]   ;;  %s1680_s1 = inlined_call_operand.hbm [shape: f32[128,128], index: 1, kind: input, shape index: {}]   ;;  %s1681_s2 = inlined_call_operand.vmem [shape: f32[16,128], index: 2, kind: input, shape index: {}]   ;;  %s1682_s3 = inlined_call_operand.hbm [shape: f32[16,128], index: 3, kind: output, shape index: {}]  }
   0x1   :  { %9 = vsyncpa [#allocation4], 0  ;;  %s1354_s12 = smov [#allocation2]   ;;  %s1306_s16 = scalar_lea.hbm %s1680_s1, 2048 }
   0x2   :  { %s17_s13 = sshll.u32 %s1354_s12, 4  ;;  %p1307_p0 = scmp.ne.s32.totalorder %s1680_s1, %s1306_s16  ;;  %s18_s13 = int_to_ptr.vmem [resolvable:$true] %s17_s13 }
   0x3   :  { %p1310_p1 = scmp.lt.u32.totalorder %s1306_s16, %s1680_s1 }
   0x5   :  { %p1312_p2 = pnand %p1310_p1, %p1307_p0 }
   0x7   :  { %1315 = shalt.err (!%p1312_p2)
}
   0x8   :  { %s1316_s21 = scalar_lea.vmem %s18_s13, 2048  ;;  %p1321_p4 = scmp.lt.s32.totalorder %s18_s13, %s18_s13 }
   0x9   :  { %p1317_p3 = scmp.ne.s32.totalorder %s18_s13, %s1316_s21  ;;  %p1322_p5 = scmp.lt.s32.totalorder %s1316_s21, %s1316_s21 }
   0xb   :  { %p1323_p6 = por %p1322_p5, %p1321_p4 }
   0xd   :  { %p1324_p7 = pnand %p1323_p6, %p1317_p3 }
   0xf   :  { %1327 = shalt.err (!%p1324_p7)
}
  0x10   :  { %s1355_s22 = smov 128   ;;  %s1356_s23 = smov 8  }
  0x11   :  { %23 = dma.hbm_to_vmem [thread:$0]  %s1680_s1, 2048, %s18_s13, [#allocation3], %s1355_s22, %s1355_s22, %s1356_s23  }
  0x12   :  { %1350 = dma.done.wait [#allocation3], 2048  }
  0x13   :  { %1351 = vsyncadd [#allocation3], 4294965248  ;;  %v1357_v0 = vmov 0   ;;  %v29_v1 = vld [vmem:[%s1679_s0] sm:$0xff]  ;;  %v46_v3 = vld [vmem:[#allocation2 + $0x8] sm:$0xff]  ;;  %s1360_s5 = smov [#allocation5]  }
  0x14   :  { %1305 = vset.pattern.permute.xlu0 %v1357_v0  ;;  %v45_v2 = vld [vmem:[#allocation2] sm:$0xff]  ;;  %v47_v5 = vld [vmem:[#allocation2 + $0x10] sm:$0xff]  ;;  %v48_v6 = vld [vmem:[#allocation2 + $0x18] sm:$0xff]  ;;  %v65_v8 = vand.u32 4294901760, %v46_v3  ;;  %s758_s6 = sshll.u32 %s1360_s5, 4  ;;  %s759_s6 = int_to_ptr.vmem [resolvable:$true] %s758_s6 }
  0x15   :  { %34 = vperm.xlu0 %1305, %v29_v1   ;;  %v62_v4 = vand.u32 4294901760, %v45_v2  ;;  %v30_v7 = vld [vmem:[%s1679_s0 + $0x8] sm:$0xff]  ;;  %v68_v9 = vand.u32 4294901760, %v47_v5  ;;  %v71_v10 = vand.u32 4294901760, %v48_v6  ;;  %v49_v11 = vld [vmem:[#allocation2 + $0x20] sm:$0xff]  ;;  %v51_v17 = vld [vmem:[#allocation2 + $0x30] sm:$0xff]  ;;  %p1333_p9 = scmp.lt.s32.totalorder %s759_s6, %s759_s6 }
  0x16   :  { %v50_v12 = vld [vmem:[#allocation2 + $0x28] sm:$0xff]  ;;  %v74_v15 = vand.u32 4294901760, %v49_v11  ;;  %v52_v18 = vld [vmem:[#allocation2 + $0x38] sm:$0xff]  ;;  %v80_v20 = vand.u32 4294901760, %v51_v17  ;;  %v53_v22 = vld [vmem:[#allocation2 + $0x40] sm:$0xff]  ;;  %v1452_v46 = vsub.f32 %v46_v3, %v65_v8  ;;  %s1328_s7 = scalar_lea.vmem %s759_s6, 256 }
  0x17   :  { %v1402_v13 = vpack.c.bf16 %v65_v8, %v62_v4  ;;  %v1404_v14 = vpack.c.bf16 %v71_v10, %v68_v9  ;;  %v77_v16 = vand.u32 4294901760, %v50_v12  ;;  %v83_v21 = vand.u32 4294901760, %v52_v18  ;;  %v54_v23 = vld [vmem:[#allocation2 + $0x48] sm:$0xff]  ;;  %v1420_v28 = vld [vmem:[#allocation2 + $0x50] sm:$0xff]  ;;  %v1428_v32 = vld [vmem:[#allocation2 + $0x58] sm:$0xff]  ;;  %p1329_p8 = scmp.ne.s32.totalorder %s759_s6, %s1328_s7  ;;  %p1334_p10 = scmp.lt.s32.totalorder %s1328_s7, %s1328_s7 }
  0x18   :  { %v1414_v24 = vsub.f32 %v47_v5, %v68_v9  ;;  %v1416_v25 = vsub.f32 %v48_v6, %v71_v10  ;;  %v86_v26 = vand.u32 4294901760, %v53_v22  ;;  %v89_v27 = vand.u32 4294901760, %v54_v23  ;;  %v1444_v41 = vld [vmem:[#allocation2 + $0x60] sm:$0xff]  ;;  %v1448_v44 = vld [vmem:[#allocation2 + $0x68] sm:$0xff]  ;;  %v1472_v58 = vld [vmem:[#allocation2 + $0x70] sm:$0xff] }
  0x19   :  { %37 = vperm.xlu0 %1305, %v30_v7   ;;  %1193 = vmatprep.subr.bf16.mxu0 %v1402_v13  ;;  %v1412_v19 = vpack.c.bf16 %v77_v16, %v74_v15  ;;  %v1426_v31 = vpack.c.bf16 %v83_v21, %v80_v20  ;;  %v92_v36 = vand.u32 4294901760, %v1420_v28  ;;  %v1435_v37 = vsub.f32 %v49_v11, %v74_v15  ;;  %v60_v61 = vld [vmem:[#allocation2 + $0x78] sm:$0xff]  ;;  %p1335_p11 = por %p1334_p10, %p1333_p9 }
  0x1a   :  { %1097 = vmatprep.subr.bf16.mxu1 %v1402_v13  ;;  %1195 = vmatpush3.bf16.msra.mxu0 %v1402_v13  ;;  %v179_v29 = vand.u32 4294901760, %v1414_v24  ;;  %v186_v30 = vand.u32 4294901760, %v1416_v25  ;;  %v1437_v38 = vsub.f32 %v50_v12, %v77_v16  ;;  %v1441_v39 = vpack.c.bf16 %v89_v27, %v86_v26 }
  0x1b   :  { %1099 = vmatpush3.bf16.msra.mxu1 %v1402_v13  ;;  %1197 = vmatprep.subr.bf16.mxu0 %v1404_v14  ;;  %v95_v40 = vand.u32 4294901760, %v1428_v32  ;;  %v1450_v45 = vsub.f32 %v45_v2, %v62_v4  ;;  %v193_v47 = vand.u32 4294901760, %v1435_v37  ;;  %v1458_v50 = vsub.f32 %v51_v17, %v80_v20  ;;  %p1336_p12 = pnand %p1335_p11, %p1329_p8 }
  0x1c   :  { %1101 = vmatprep.subr.bf16.mxu1 %v1404_v14  ;;  %v1430_v33 = vpack.c.bf16 %v186_v30, %v179_v29  ;;  %v180_v34 = vsub.f32 %v1414_v24, %v179_v29  ;;  %v187_v35 = vsub.f32 %v1416_v25, %v186_v30  ;;  %v200_v48 = vand.u32 4294901760, %v1437_v38 }
  0x1d   :  { %v1460_v51 = vsub.f32 %v52_v18, %v83_v21  ;;  %v98_v52 = vand.u32 4294901760, %v1444_v41  ;;  %v194_v54 = vsub.f32 %v1435_v37, %v193_v47  ;;  %v1469_v56 = vpack.c.bf16 %v95_v40, %v92_v36 }
  0x1e   :  { %1199 = vmatpush3.bf16.msra.mxu0 %v1404_v14  ;;  %v181_v42 = vand.u32 4294901760, %v180_v34  ;;  %v188_v43 = vand.u32 4294901760, %v187_v35  ;;  %v1463_v53 = vpack.c.bf16 %v200_v48, %v193_v47  ;;  %v201_v55 = vsub.f32 %v1437_v38, %v200_v48 }
  0x1f   :  { %1103 = vmatpush3.bf16.msra.mxu1 %v1404_v14  ;;  %1201 = vmatprep.subr.bf16.mxu0 %v1412_v19  ;;  %v101_v57 = vand.u32 4294901760, %v1448_v44  ;;  %v207_v59 = vand.u32 4294901760, %v1458_v50  ;;  %v214_v60 = vand.u32 4294901760, %v1460_v51  ;;  %v165_v62 = vand.u32 4294901760, %v1450_v45 }
  0x20   :  { %1105 = vmatprep.subr.bf16.mxu1 %v1412_v19  ;;  %v1456_v49 = vpack.c.bf16 %v188_v43, %v181_v42  ;;  %v172_v63 = vand.u32 4294901760, %v1452_v46  ;;  %v195_v0 = vand.u32 4294901760, %v194_v54  ;;  %v202_v1 = vand.u32 4294901760, %v201_v55 }
  0x21   :  { %v1480_v2 = vpack.c.bf16 %v214_v60, %v207_v59  ;;  %v208_v3 = vsub.f32 %v1458_v50, %v207_v59  ;;  %v215_v4 = vsub.f32 %v1460_v51, %v214_v60  ;;  %v1484_v5 = vsub.f32 %v53_v22, %v86_v26 }
  0x22   :  { %1203 = vmatpush3.bf16.msra.mxu0 %v1412_v19  ;;  %v104_v6 = vand.u32 4294901760, %v1472_v58  ;;  %v1487_v7 = vpack.c.bf16 %v202_v1, %v195_v0  ;;  %v1489_v8 = vsub.f32 %v54_v23, %v89_v27  ;;  %v107_v9 = vand.u32 4294901760, %v60_v61 }
  0x23   :  { %1107 = vmatpush3.bf16.msra.mxu1 %v1412_v19  ;;  %1205 = vmatprep.subr.bf16.mxu0 %v1426_v31  ;;  %v209_v10 = vand.u32 4294901760, %v208_v3  ;;  %v216_v11 = vand.u32 4294901760, %v215_v4  ;;  %v221_v12 = vand.u32 4294901760, %v1484_v5  ;;  %v1496_v15 = vpack.c.bf16 %v101_v57, %v98_v52 }
  0x24   :  { %1109 = vmatprep.subr.bf16.mxu1 %v1426_v31  ;;  %v166_v16 = vsub.f32 %v1450_v45, %v165_v62  ;;  %v173_v17 = vsub.f32 %v1452_v46, %v172_v63  ;;  %v228_v18 = vand.u32 4294901760, %v1489_v8  ;;  %v234_v22 = vsub.f32 %v1420_v28, %v92_v36 }
  0x25   :  { %v1501_v20 = vpack.c.bf16 %v216_v11, %v209_v10  ;;  %v222_v21 = vsub.f32 %v1484_v5, %v221_v12  ;;  %v241_v23 = vsub.f32 %v1428_v32, %v95_v40  ;;  %v1513_v35 = vpack.c.bf16 %v107_v9, %v104_v6 }
  0x26   :  { %1207 = vmatpush3.bf16.msra.mxu0 %v1426_v31  ;;  %v1506_v26 = vpack.c.bf16 %v228_v18, %v221_v12  ;;  %v229_v27 = vsub.f32 %v1489_v8, %v228_v18  ;;  %v235_v30 = vand.u32 4294901760, %v234_v22  ;;  %v167_v28 = vand.u32 4294901760, %v166_v16 }
  0x27   :  { %1111 = vmatpush3.bf16.msra.mxu1 %v1426_v31  ;;  %1209 = vmatprep.subr.bf16.mxu0 %v1441_v39  ;;  %v223_v29 = vand.u32 4294901760, %v222_v21  ;;  %v242_v34 = vand.u32 4294901760, %v241_v23  ;;  %v174_v36 = vand.u32 4294901760, %v173_v17  ;;  %v248_v47 = vsub.f32 %v1444_v41, %v98_v52 }
  0x28   :  { %1113 = vmatprep.subr.bf16.mxu1 %v1441_v39  ;;  %v230_v32 = vand.u32 4294901760, %v229_v27  ;;  %v236_v42 = vsub.f32 %v234_v22, %v235_v30  ;;  %v255_v54 = vsub.f32 %v1448_v44, %v101_v57  ;;  %v1224_v0 = vpack.c.bf16 %v172_v63, %v165_v62 }
  0x29   :  { %v1515_v40 = vpack.c.bf16 %v242_v34, %v235_v30  ;;  %v243_v43 = vsub.f32 %v241_v23, %v242_v34  ;;  %v249_v60 = vand.u32 4294901760, %v248_v47  ;;  %v1128_v1 = vpack.c.bf16 %v174_v36, %v167_v28 }
  0x2a   :  { %1211 = vmatpush3.bf16.msra.mxu0 %v1441_v39  ;;  %v1518_v48 = vpack.c.bf16 %v230_v32, %v223_v29  ;;  %v237_v55 = vand.u32 4294901760, %v236_v42  ;;  %v256_v3 = vand.u32 4294901760, %v255_v54  ;;  %v262_v52 = vsub.f32 %v1472_v58, %v104_v6 }
  0x2b   :  { %1115 = vmatpush3.bf16.msra.mxu1 %v1441_v39  ;;  %1213 = vmatprep.subr.bf16.mxu0 %v1469_v56  ;;  %v244_v59 = vand.u32 4294901760, %v243_v43  ;;  %v250_v41 = vsub.f32 %v248_v47, %v249_v60  ;;  %v269_v44 = vsub.f32 %v60_v61, %v107_v9  ;;  %v1538_v9 = vpack.c.bf16 %v1452_v46, %v1450_v45 }
  0x2c   :  { %1117 = vmatprep.subr.bf16.mxu1 %v1469_v56  ;;  %v1528_v57 = vpack.c.bf16 %v256_v3, %v249_v60  ;;  %v257_v10 = vsub.f32 %v255_v54, %v256_v3  ;;  %v263_v12 = vand.u32 4294901760, %v262_v52  ;;  %v1542_v27 = vpack.c.bf16 %v1416_v25, %v1414_v24 }
  0x2d   :  { %v1525_v4 = vpack.c.bf16 %v244_v59, %v237_v55  ;;  %v251_v11 = vand.u32 4294901760, %v250_v41  ;;  %v270_v16 = vand.u32 4294901760, %v269_v44  ;;  %v1546_v29 = vpack.c.bf16 %v1437_v38, %v1435_v37 }
  0x2e   :  { %1215 = vmatpush3.bf16.msra.mxu0 %v1469_v56  ;;  %v258_v62 = vand.u32 4294901760, %v257_v10  ;;  %v264_v17 = vsub.f32 %v262_v52, %v263_v12  ;;  %v1550_v30 = vpack.c.bf16 %v1460_v51, %v1458_v50  ;;  %v1554_v34 = vpack.c.bf16 %v1489_v8, %v1484_v5 }
  0x2f   :  { %1119 = vmatpush3.bf16.msra.mxu1 %v1469_v56  ;;  %1217 = vmatprep.subr.bf16.mxu0 %v1496_v15  ;;  %v1532_v63 = vpack.c.bf16 %v270_v16, %v263_v12  ;;  %v271_v18 = vsub.f32 %v269_v44, %v270_v16  ;;  %v1556_v28 = vpack.c.bf16 %v241_v23, %v234_v22  ;;  %v31_v24 = vlaneseq }
  0x30   :  { %1121 = vmatprep.subr.bf16.mxu1 %v1496_v15  ;;  %v1152_v21 = vpack.c.bf16 %v258_v62, %v251_v11  ;;  %v265_v58 = vand.u32 4294901760, %v264_v17  ;;  %v1558_v45 = vpack.c.bf16 %v255_v54, %v248_v47  ;;  %v1560_v46 = vpack.c.bf16 %v269_v44, %v262_v52 }
  0x31   :  { %v272_v61 = vand.u32 4294901760, %v271_v18  ;;  %v1562_v25 = vand.u32 127, %v31_v24  ;;  %v1358_v37 = vmov 0.0   ;;  %v1359_v47 = vmov 1.0  }
  0x32   :  { %1219 = vmatpush3.bf16.msra.mxu0 %v1496_v15 }
  0x33   :  { %1123 = vmatpush3.bf16.msra.mxu1 %v1496_v15  ;;  %1221 = vmatprep.subr.bf16.mxu0 %v1513_v35  ;;  %v1534_v6 = vpack.c.bf16 %v272_v61, %v265_v58 }
  0x34   :  { %1125 = vmatprep.subr.bf16.mxu1 %v1513_v35 }
  0x36   :  { %1223 = vmatpush3.bf16.msra.mxu0 %v1513_v35 }
  0x37   :  { %1127 = vmatpush3.bf16.msra.mxu1 %v1513_v35  ;;  %1225 = vmatprep.subr.bf16.mxu0 %v1224_v0 }
  0x38   :  { %1129 = vmatprep.subr.bf16.mxu1 %v1128_v1 }
  0x94   :  { %v35_v36 = vpop.permute.xlu0 %34 }
  0x95   :  { %vm39_vm0 = vcmp.eq.s32.totalorder %v35_v36, %v1562_v25 }
  0x96   :  { %v770_v38 = vsel %vm39_vm0, 1.0, %v1358_v37 }
  0x97   :  { %v143_v50 = vsub.f32 %v770_v38, %v770_v38 }
  0x98   :  { %v1567_v51 = vpop.permute.xlu0 %37 }
  0x99   :  { %vm40_vm1 = vcmp.eq.s32.totalorder %v1567_v51, %v1562_v25  ;;  %v144_v5 = vand.u32 4294901760, %v143_v50 }
  0x9a   :  { %v771_v8 = vsel %vm40_vm1, 1.0, %v1358_v37 }
  0x9b   :  { %v1574_v22 = vsub.f32 %v771_v8, %v771_v8  ;;  %1023 = vmatprep.mubr.f32.mxu0 %v144_v5  ;;  %v145_v23 = vsub.f32 %v143_v50, %v144_v5 }
  0x9d   :  { %v146_v32 = vand.u32 4294901760, %v145_v23  ;;  %v154_v42 = vand.u32 4294901760, %v1574_v22 }
  0x9f   :  { %918 = vmatprep.mubr.f32.mxu1 %v146_v32  ;;  %1024 = vmatmul.mubr.f32.vlgmr.msra.gmra.mrb[0].mxu0 %v154_v42  ;;  %v155_v43 = vsub.f32 %v1574_v22, %v154_v42 }
  0xa0   :  { %1227 = vmatpush3.bf16.msra.mxu0 %v1224_v0  ;;  %1058 = vmatprep.mubr.msk.f32.mxu0 %vm39_vm0, %v1359_v47 }
  0xa1   :  { %1229 = vmatprep.subr.bf16.mxu0 %v1430_v33  ;;  %v156_v54 = vand.u32 4294901760, %v155_v43 }
  0xa3   :  { %919 = vmatmul.mubr.f32.vlgmr.msra.gmra.mrb[0].mxu1 %v156_v54 }
  0xa4   :  { %1131 = vmatpush3.bf16.msra.mxu1 %v1128_v1  ;;  %1231 = vmatpush3.bf16.msra.mxu0 %v1430_v33 }
  0xa5   :  { %953 = vmatprep.mubr.msk.f32.mxu1 %vm39_vm0, %v1359_v47  ;;  %1133 = vmatprep.subr.bf16.mxu1 %v1456_v49 }
  0xa6   :  { %1233 = vmatprep.subr.bf16.mxu0 %v1463_v53 }
  0xa8   :  { %1135 = vmatpush3.bf16.msra.mxu1 %v1456_v49  ;;  %1235 = vmatpush3.bf16.msra.mxu0 %v1463_v53 }
  0xa9   :  { %1137 = vmatprep.subr.bf16.mxu1 %v1487_v7  ;;  %1237 = vmatprep.subr.bf16.mxu0 %v1480_v2 }
  0xac   :  { %1139 = vmatpush3.bf16.msra.mxu1 %v1487_v7  ;;  %1239 = vmatpush3.bf16.msra.mxu0 %v1480_v2 }
  0xad   :  { %1141 = vmatprep.subr.bf16.mxu1 %v1501_v20  ;;  %1241 = vmatprep.subr.bf16.mxu0 %v1506_v26 }
  0xb0   :  { %1143 = vmatpush3.bf16.msra.mxu1 %v1501_v20  ;;  %1243 = vmatpush3.bf16.msra.mxu0 %v1506_v26 }
  0xb1   :  { %1145 = vmatprep.subr.bf16.mxu1 %v1518_v48  ;;  %1245 = vmatprep.subr.bf16.mxu0 %v1515_v40 }
  0xb4   :  { %1147 = vmatpush3.bf16.msra.mxu1 %v1518_v48  ;;  %1247 = vmatpush3.bf16.msra.mxu0 %v1515_v40 }
  0xb5   :  { %1149 = vmatprep.subr.bf16.mxu1 %v1525_v4  ;;  %1249 = vmatprep.subr.bf16.mxu0 %v1528_v57 }
  0xb8   :  { %1151 = vmatpush3.bf16.msra.mxu1 %v1525_v4  ;;  %1251 = vmatpush3.bf16.msra.mxu0 %v1528_v57 }
  0xb9   :  { %1153 = vmatprep.subr.bf16.mxu1 %v1152_v21  ;;  %1253 = vmatprep.subr.bf16.mxu0 %v1532_v63 }
  0xbc   :  { %1155 = vmatpush3.bf16.msra.mxu1 %v1152_v21  ;;  %1255 = vmatpush3.bf16.msra.mxu0 %v1532_v63 }
  0xbd   :  { %1157 = vmatprep.subr.bf16.mxu1 %v1534_v6  ;;  %1257 = vmatprep.subr.bf16.mxu0 %v1402_v13 }
  0xbf   :  { %1059 = vmatmul.mubr.msk.f32.vlgmr.msra.gmra.mrb[0].mxu0 %vm40_vm1, %v1359_v47 }
  0xc0   :  { %1159 = vmatpush3.bf16.msra.mxu1 %v1534_v6  ;;  %1259 = vmatpush3.bf16.msra.mxu0 %v1402_v13 }
  0xc1   :  { %1093 = vmatprep.mubr.msk.f32.mxu0 %vm39_vm0, %v1359_v47  ;;  %1161 = vmatprep.subr.bf16.mxu1 %v1538_v9 }
  0xc2   :  { %1261 = vmatprep.subr.bf16.mxu0 %v1404_v14 }
  0xc3   :  { %954 = vmatmul.mubr.msk.f32.vlgmr.msra.gmra.mrb[0].mxu1 %vm40_vm1, %v1359_v47 }
  0xc4   :  { %1163 = vmatpush3.bf16.msra.mxu1 %v1538_v9  ;;  %988 = vmatprep.mubr.f32.mxu1 %v143_v50 }
  0xc5   :  { %1263 = vmatpush3.bf16.msra.mxu0 %v1404_v14  ;;  %1165 = vmatprep.subr.bf16.mxu1 %v1542_v27 }
  0xc6   :  { %1265 = vmatprep.subr.bf16.mxu0 %v1412_v19 }
  0xc8   :  { %1167 = vmatpush3.bf16.msra.mxu1 %v1542_v27 }
  0xc9   :  { %1267 = vmatpush3.bf16.msra.mxu0 %v1412_v19  ;;  %1169 = vmatprep.subr.bf16.mxu1 %v1546_v29 }
  0xca   :  { %1269 = vmatprep.subr.bf16.mxu0 %v1426_v31 }
  0xcc   :  { %1171 = vmatpush3.bf16.msra.mxu1 %v1546_v29 }
  0xcd   :  { %1271 = vmatpush3.bf16.msra.mxu0 %v1426_v31  ;;  %1173 = vmatprep.subr.bf16.mxu1 %v1550_v30 }
  0xce   :  { %1273 = vmatprep.subr.bf16.mxu0 %v1441_v39 }
  0xd0   :  { %1175 = vmatpush3.bf16.msra.mxu1 %v1550_v30 }
  0xd1   :  { %1275 = vmatpush3.bf16.msra.mxu0 %v1441_v39  ;;  %1177 = vmatprep.subr.bf16.mxu1 %v1554_v34  ;;  %v746_v39 = vld [vmem:[%s1681_s2 + $0x8] sm:$0xff] }
  0xd2   :  { %1277 = vmatprep.subr.bf16.mxu0 %v1469_v56 }
  0xd4   :  { %1179 = vmatpush3.bf16.msra.mxu1 %v1554_v34 }
  0xd5   :  { %1279 = vmatpush3.bf16.msra.mxu0 %v1469_v56  ;;  %1181 = vmatprep.subr.bf16.mxu1 %v1556_v28  ;;  %v745_v56 = vld [vmem:[%s1681_s2] sm:$0xff] }
  0xd6   :  { %1281 = vmatprep.subr.bf16.mxu0 %v1496_v15 }
  0xd8   :  { %1183 = vmatpush3.bf16.msra.mxu1 %v1556_v28 }
  0xd9   :  { %1283 = vmatpush3.bf16.msra.mxu0 %v1496_v15  ;;  %1185 = vmatprep.subr.bf16.mxu1 %v1558_v45 }
  0xda   :  { %1285 = vmatprep.subr.bf16.mxu0 %v1513_v35 }
  0xdc   :  { %1187 = vmatpush3.bf16.msra.mxu1 %v1558_v45 }
  0xdd   :  { %1287 = vmatpush3.bf16.msra.mxu0 %v1513_v35  ;;  %1189 = vmatprep.subr.bf16.mxu1 %v1560_v46 }
  0xe0   :  { %1094 = vmatmul.mubr.msk.f32.vlgmr.msra.gmra.mrb[0].mxu0 %vm40_vm1, %v1359_v47  ;;  %1191 = vmatpush3.bf16.msra.mxu1 %v1560_v46 }
  0xe3   :  { %989 = vmatmul.mubr.f32.vlgmr.msra.gmra.mrb[0].mxu1 %v1574_v22 }
 0x1b3   :  { %v1095_v13 = vpop.f32.mrb[0].mxu0 }
 0x1b4   :  { %v735_v14 = vpop.f32.mrb[1].mxu0 }
 0x1b6   :  { %v990_v19 = vpop.f32.mrb[0].mxu1 }
 0x1b7   :  { %v1288_v31 = vadd.f32 %v1095_v13, %v990_v19  ;;  %v419_v33 = vpop.f32.mrb[1].mxu1 }
 0x1b8   :  { %v1289_v49 = vadd.f32 %v735_v14, %v419_v33 }
 0x1b9   :  { %v748_v53 = vmul.f32 2.0, %v1288_v31 }
 0x1ba   :  { %v747_v2 = vmul.f32 2.0, %v1289_v49 }
 0x1bb   :  { %v750_v7 = vadd.f32 %v748_v53, %v746_v39 }
 0x1bc   :  { %v749_v15 = vadd.f32 %v747_v2, %v745_v56 }
 0x1bd   :  { %752 = vst [vmem:[#allocation5 + $0x8] sm:$0xff] %v750_v7 }
 0x1be   :  { %751 = vst [vmem:[#allocation5] sm:$0xff] %v749_v15 }
 0x1bf   :  { %1339 = shalt.err (!%p1336_p12)
}
 0x1c0   :  { %s1340_s10 = scalar_lea.hbm %s1682_s3, 256 }
 0x1c1   :  { %p1341_p13 = scmp.ne.s32.totalorder %s1682_s3, %s1340_s10  ;;  %p1344_p0 = scmp.lt.u32.totalorder %s1340_s10, %s1682_s3 }
 0x1c3   :  { %p1346_p1 = pnand %p1344_p0, %p1341_p13 }
 0x1c5   :  { %1349 = shalt.err (!%p1346_p1)
}
 0x1c6   :  { %764 = dma.vmem_to_hbm [thread:$0]  %s759_s6, 256, %s1682_s3, [#allocation4], %s1355_s22, %s1355_s22, %s1356_s23  }
 0x1c7   :  { %1352 = dma.done.wait [#allocation4], 256  }
 0x1c8   :  { %1353 = vsyncadd [#allocation4], 4294967040 }
 0x1c9   :  { %768 = vsyncpa [#allocation3], 1 }
 0x1ca   :  { %769 = vsyncpa [#allocation4], 1 }

</bundles_post_ra>
